<compile_context>
chip_gen: v7x
topology: tpu7x:2x2x1
jax: 0.10.0
libtpu: 0.0.40
codegen_flags: <defaults>
</compile_context>

<pallas_src>
import math

import jax
import jax.numpy as jnp
from jax.experimental import pallas as pl
from jax.experimental.pallas import tpu as pltpu

LANE = 128
SUBLANE = 8


def _round_up(n, m):
    return (n + m - 1) // m * m


def _choose_tile_b(B, tile_b):
    """Pick a sublane-aligned batch tile; keep >= 2 grid steps when possible."""
    b_pad = _round_up(B, SUBLANE)
    tile_b = min(_round_up(tile_b, SUBLANE), b_pad)
    # v7x has 2 TensorCores per chip; a grid of length 1 serializes all work
    # on one core, so split the batch when it is big enough.
    if tile_b > 128 and -(-b_pad // tile_b) < 2:
        tile_b = _round_up(-(-b_pad // 2), SUBLANE)
    return tile_b


# --------------------------------------------------------------------------
# Kernels
# --------------------------------------------------------------------------
def ae_forward_kernel(x_ref, w1_ref, b1_ref, w23_ref, b23_ref, w4_ref, b4_ref,
                      recon_ref):
    # Cast the streamed f32 input to bf16 in-kernel (MXU operand path).
    xb = x_ref[...].astype(jnp.bfloat16)                           # (tb, D)

    # encoder layer 1:  relu(x @ W1 + b1)   -- bias/ReLU in f32 (v5e-safe)
    h = jnp.dot(xb, w1_ref[...], preferred_element_type=jnp.float32) + b1_ref[...]
    h = jnp.maximum(h, 0.0).astype(jnp.bfloat16)                   # (tb, Hp)

    # fused (enc layer 2) @ (dec layer 1):  relu(h @ W23 + b23)
    h2 = jnp.dot(h, w23_ref[...], preferred_element_type=jnp.float32) + b23_ref[...]
    h2 = jnp.maximum(h2, 0.0).astype(jnp.bfloat16)                 # (tb, Hp)

    # decoder layer 2:  h2 @ W4 + b4
    recon = jnp.dot(h2, w4_ref[...], preferred_element_type=jnp.float32) + b4_ref[...]
    recon_ref[...] = recon.astype(recon_ref.dtype)                 # (tb, D)


def ae_encode_kernel(x_ref, w1_ref, b1_ref, w2_ref, b2_ref, z_ref):
    xb = x_ref[...].astype(jnp.bfloat16)
    h = jnp.dot(xb, w1_ref[...], preferred_element_type=jnp.float32) + b1_ref[...]
    h = jnp.maximum(h, 0.0).astype(jnp.bfloat16)
    z = jnp.dot(h, w2_ref[...], preferred_element_type=jnp.float32) + b2_ref[...]
    z_ref[...] = z.astype(z_ref.dtype)                             # (tb, L)


# --------------------------------------------------------------------------
# Wrappers
# --------------------------------------------------------------------------
def _run_mlp(kernel, x, weights, biases, out_width, flops_per_row, *, tile_b):
    """Shared driver: batch-gridded kernel, resident params, narrow output."""
    B, D = x.shape
    tile_b = _choose_tile_b(B, tile_b)
    Bp = _round_up(B, tile_b)
    x_in = x if Bp == B else jnp.pad(x, ((0, Bp - B), (0, 0)))
    grid = (Bp // tile_b,)

    def act_spec(width):        # streamed per-batch-tile blocks
        return pl.BlockSpec((tile_b, width), lambda i: (i, 0))

    def res_spec(arr):          # resident across grid steps (constant index)
        return pl.BlockSpec(arr.shape, lambda i: (0, 0))

    param_bytes = sum(int(w.size) * 2 for w in weights) \
        + sum(int(b.size) * 4 for b in biases)
    io_tile_bytes = tile_b * (D + out_width) * 4
    # Double-buffered input/output tiles + (double-buffered) resident params,
    # plus generous headroom for compiler-internal scratch.
    vmem_limit = int(min(64 << 20, max(8 << 20, 4 * (io_tile_bytes + param_bytes))))

    cost = pl.CostEstimate(
        flops=int(Bp * flops_per_row),
        transcendentals=0,
        bytes_accessed=int(Bp * (D + out_width) * 4 + param_bytes))

    in_specs = [act_spec(D)]
    operands = [x_in]
    for w, b in zip(weights, biases):
        in_specs += [res_spec(w), res_spec(b)]
        operands += [w, b]

    out = pl.pallas_call(
        kernel,
        grid=grid,
        in_specs=in_specs,
        out_specs=act_spec(out_width),
        out_shape=jax.ShapeDtypeStruct((Bp, out_width), x.dtype),
        compiler_params=pltpu.CompilerParams(
            dimension_semantics=("parallel",),
            vmem_limit_bytes=vmem_limit),
        cost_estimate=cost,
    )(*operands)

    return out if Bp == B else out[:B]


def ae_forward(x, params, *, tile_b=512):
    """decoder(encoder(x)) — the module's forward()."""
    D, H, L = params["dims"]
    Hp = params["Hp"]
    assert x.shape[1] == D
    flops_per_row = 2 * (D * Hp + Hp * Hp + Hp * D)
    return _run_mlp(
        ae_forward_kernel, x,
        weights=(params["enc_w1"], params["w23"], params["dec_w2"]),
        biases=(params["enc_b1"], params["b23"], params["dec_b2"]),
        out_width=D, flops_per_row=flops_per_row, tile_b=tile_b)


def ae_encode(x, params, *, tile_b=512):
    """encoder(x) — the module's encode() / state_dim_reduction()."""
    D, H, L = params["dims"]
    Hp = params["Hp"]
    assert x.shape[1] == D
    flops_per_row = 2 * (D * Hp + Hp * L)
    return _run_mlp(
        ae_encode_kernel, x,
        weights=(params["enc_w1"], params["enc_w2"]),
        biases=(params["enc_b1"], params["enc_b2"]),
        out_width=L, flops_per_row=flops_per_row, tile_b=tile_b)


# --------------------------------------------------------------------------
# Parameters (PyTorch nn.Linear-style init), stored kernel-ready:
#   bf16 weights, f32 biases, hidden dims padded to 128 lanes, the input (K)
#   dim of layer 1 and the output (N) dims of the z / recon layers unpadded.
# --------------------------------------------------------------------------
def _init_linear(key, fan_in, fan_out):
    kw, kb = jax.random.split(key)
    bound = 1.0 / math.sqrt(fan_in)
    w = jax.random.uniform(kw, (fan_in, fan_out), jnp.float32,
                           minval=-bound, maxval=bound)
    b = jax.random.uniform(kb, (fan_out,), jnp.float32,
                           minval=-bound, maxval=bound)
    return w, b


def _pad2(a, rows, cols):
    return jnp.zeros((rows, cols), a.dtype).at[:a.shape[0], :a.shape[1]].set(a)


def make_params(key, state_dim, hidden_dim, latent_dim):
    D, H, L = state_dim, hidden_dim, latent_dim
    Hp = _round_up(H, LANE)
    k1, k2, k3, k4 = jax.random.split(key, 4)
    w1, b1 = _init_linear(k1, D, H)     # encoder: D -> H
    w2, b2 = _init_linear(k2, H, L)     # encoder: H -> L
    w3, b3 = _init_linear(k3, L, H)     # decoder: L -> H
    w4, b4 = _init_linear(k4, H, D)     # decoder: H -> D

    # Algebraic fusion of the two linears around the latent (no nonlinearity
    # between them):  (h@W2 + b2)@W3 + b3 == h@(W2@W3) + (b2@W3 + b3).
    w23 = w2 @ w3                               # (H, H)
    b23 = b2[None, :] @ w3 + b3[None, :]        # (1, H)

    bf = jnp.bfloat16
    return dict(
        dims=(D, H, L), Hp=Hp,
        enc_w1=_pad2(w1, D, Hp).astype(bf),        # K unpadded: raw x streams in
        enc_b1=_pad2(b1[None, :], 1, Hp),
        enc_w2=_pad2(w2, Hp, L).astype(bf),        # N unpadded: z emitted at width L
        enc_b2=b2[None, :],
        w23=_pad2(w23, Hp, Hp).astype(bf),
        b23=_pad2(b23, 1, Hp),
        dec_w2=_pad2(w4, Hp, D).astype(bf),        # N unpadded: recon emitted at width D
        dec_b2=b4[None, :],
    )


# --------------------------------------------------------------------------
# Pure-JAX references with identical mixed precision (bf16 operands, f32
# accumulate / bias / ReLU).
# --------------------------------------------------------------------------
def ae_forward_ref(x, params):
    xb = x.astype(jnp.bfloat16)
    h = jnp.maximum(jnp.dot(xb, params["enc_w1"],
                            preferred_element_type=jnp.float32)
                    + params["enc_b1"], 0.0).astype(jnp.bfloat16)
    h2 = jnp.maximum(jnp.dot(h, params["w23"],
                             preferred_element_type=jnp.float32)
                     + params["b23"], 0.0).astype(jnp.bfloat16)
    recon = jnp.dot(h2, params["dec_w2"],
                    preferred_element_type=jnp.float32) + params["dec_b2"]
    return recon.astype(x.dtype)


def ae_encode_ref(x, params):
    xb = x.astype(jnp.bfloat16)
    h = jnp.maximum(jnp.dot(xb, params["enc_w1"],
                            preferred_element_type=jnp.float32)
                    + params["enc_b1"], 0.0).astype(jnp.bfloat16)
    z = jnp.dot(h, params["enc_w2"],
                preferred_element_type=jnp.float32) + params["enc_b2"]
    return z.astype(x.dtype)


if __name__ == "__main__":
    key = jax.random.PRNGKey(0)
    k_x, k_p = jax.random.split(key)

    B, D, H, L = 256, 32, 64, 8        # batch, state_dim, hidden, latent
    x = jax.random.normal(k_x, (B, D), dtype=jnp.float32)
    params = make_params(k_p, D, H, L)

    recon = jax.block_until_ready(ae_forward(x, params))      # forward()
    z = jax.block_until_ready(ae_encode(x, params))           # state_dim_reduction()

    recon_ref = ae_forward_ref(x, params)
    z_ref = ae_encode_ref(x, params)
    assert recon.shape == (B, D) and z.shape == (B, L)
    assert jnp.allclose(recon, recon_ref, atol=2e-3, rtol=2e-3)
    assert jnp.allclose(z, z_ref, atol=2e-3, rtol=2e-3)

    # Ragged-batch path (batch not a multiple of the tile -> padded grid).
    xr = x[:50]
    recon_r = jax.block_until_ready(ae_forward(xr, params))
    assert recon_r.shape == (50, D)
    assert jnp.allclose(recon_r, recon_ref[:50], atol=2e-3, rtol=2e-3)

    # TODO(synk): loss_function (MSE + KLD) is VAE-style training bookkeeping
    # outside the forward hot path; left in plain JAX / not kernelized.
    print("KERNEL_OK")
</pallas_src>

<mosaic_0001>
module attributes {stable_mosaic.version = 11 : i64} {
  func.func @ae_forward_kernel(%arg0: i32, %arg1: memref<128x32xf32, #tpu.memory_space<vmem>>, %arg2: memref<32x128xbf16, #tpu.memory_space<vmem>>, %arg3: memref<1x128xf32, #tpu.memory_space<vmem>>, %arg4: memref<128x128xbf16, #tpu.memory_space<vmem>>, %arg5: memref<1x128xf32, #tpu.memory_space<vmem>>, %arg6: memref<128x32xbf16, #tpu.memory_space<vmem>>, %arg7: memref<1x32xf32, #tpu.memory_space<vmem>>, %arg8: memref<128x32xf32, #tpu.memory_space<vmem>>) attributes {dimension_semantics = [#tpu.dimension_semantics<parallel>], iteration_bounds = array<i64: 2>, scalar_prefetch = 0 : i64, scratch_operands = 0 : i64, tpu.core_type = #tpu.core_type<tc>, window_params = [{transform_indices = @transform_0, window_bounds = array<i64: 128, 32>}, {pipeline_mode = #tpu.pipeline_mode<synchronous>, transform_indices = @transform_1, window_bounds = array<i64: 32, 128>}, {pipeline_mode = #tpu.pipeline_mode<synchronous>, transform_indices = @transform_2, window_bounds = array<i64: 1, 128>}, {pipeline_mode = #tpu.pipeline_mode<synchronous>, transform_indices = @transform_3, window_bounds = array<i64: 128, 128>}, {pipeline_mode = #tpu.pipeline_mode<synchronous>, transform_indices = @transform_4, window_bounds = array<i64: 1, 128>}, {pipeline_mode = #tpu.pipeline_mode<synchronous>, transform_indices = @transform_5, window_bounds = array<i64: 128, 32>}, {pipeline_mode = #tpu.pipeline_mode<synchronous>, transform_indices = @transform_6, window_bounds = array<i64: 1, 32>}, {transform_indices = @transform_7, window_bounds = array<i64: 128, 32>}]} {
    %c0 = arith.constant 0 : index
    %c0_0 = arith.constant 0 : index
    %0 = vector.load %arg1[%c0, %c0_0] : memref<128x32xf32, #tpu.memory_space<vmem>>, vector<128x32xf32>
    %1 = arith.truncf %0 : vector<128x32xf32> to vector<128x32xbf16>
    %c0_1 = arith.constant 0 : index
    %c0_2 = arith.constant 0 : index
    %2 = vector.load %arg2[%c0_1, %c0_2] : memref<32x128xbf16, #tpu.memory_space<vmem>>, vector<32x128xbf16>
    %cst = arith.constant dense<0.000000e+00> : vector<128x128xf32>
    %3 = tpu.matmul %1, %2, %cst {dimension_numbers = #tpu.dot_dimension_numbers<[1], [0], [0], [1], [0, 0, 1, 1], [], []>} : vector<128x32xbf16>, vector<32x128xbf16>, vector<128x128xf32> -> vector<128x128xf32>
    %c0_3 = arith.constant 0 : index
    %c0_4 = arith.constant 0 : index
    %4 = vector.load %arg3[%c0_3, %c0_4] : memref<1x128xf32, #tpu.memory_space<vmem>>, vector<1x128xf32>
    %5 = vector.broadcast %4 : vector<1x128xf32> to vector<128x128xf32>
    %6 = arith.addf %3, %5 : vector<128x128xf32>
    %cst_5 = arith.constant 0.000000e+00 : f32
    %7 = vector.broadcast %cst_5 : f32 to vector<128x128xf32>
    %8 = arith.maximumf %6, %7 : vector<128x128xf32>
    %9 = arith.truncf %8 : vector<128x128xf32> to vector<128x128xbf16>
    %c0_6 = arith.constant 0 : index
    %c0_7 = arith.constant 0 : index
    %10 = vector.load %arg4[%c0_6, %c0_7] : memref<128x128xbf16, #tpu.memory_space<vmem>>, vector<128x128xbf16>
    %cst_8 = arith.constant dense<0.000000e+00> : vector<128x128xf32>
    %11 = tpu.matmul %9, %10, %cst_8 {dimension_numbers = #tpu.dot_dimension_numbers<[1], [0], [0], [1], [0, 0, 1, 1], [], []>} : vector<128x128xbf16>, vector<128x128xbf16>, vector<128x128xf32> -> vector<128x128xf32>
    %c0_9 = arith.constant 0 : index
    %c0_10 = arith.constant 0 : index
    %12 = vector.load %arg5[%c0_9, %c0_10] : memref<1x128xf32, #tpu.memory_space<vmem>>, vector<1x128xf32>
    %13 = vector.broadcast %12 : vector<1x128xf32> to vector<128x128xf32>
    %14 = arith.addf %11, %13 : vector<128x128xf32>
    %cst_11 = arith.constant 0.000000e+00 : f32
    %15 = vector.broadcast %cst_11 : f32 to vector<128x128xf32>
    %16 = arith.maximumf %14, %15 : vector<128x128xf32>
    %17 = arith.truncf %16 : vector<128x128xf32> to vector<128x128xbf16>
    %c0_12 = arith.constant 0 : index
    %c0_13 = arith.constant 0 : index
    %18 = vector.load %arg6[%c0_12, %c0_13] : memref<128x32xbf16, #tpu.memory_space<vmem>>, vector<128x32xbf16>
    %cst_14 = arith.constant dense<0.000000e+00> : vector<128x32xf32>
    %19 = tpu.matmul %17, %18, %cst_14 {dimension_numbers = #tpu.dot_dimension_numbers<[1], [0], [0], [1], [0, 0, 1, 1], [], []>} : vector<128x128xbf16>, vector<128x32xbf16>, vector<128x32xf32> -> vector<128x32xf32>
    %c0_15 = arith.constant 0 : index
    %c0_16 = arith.constant 0 : index
    %20 = vector.load %arg7[%c0_15, %c0_16] : memref<1x32xf32, #tpu.memory_space<vmem>>, vector<1x32xf32>
    %21 = vector.broadcast %20 : vector<1x32xf32> to vector<128x32xf32>
    %22 = arith.addf %19, %21 : vector<128x32xf32>
    %c0_17 = arith.constant 0 : index
    %c0_18 = arith.constant 0 : index
    %23 = vector.load %arg8[%c0_17, %c0_18] : memref<128x32xf32, #tpu.memory_space<vmem>>, vector<128x32xf32>
    tpu.vector_store %arg8[%c0_17, %c0_18], %22 {strides = array<i32>} : memref<128x32xf32, #tpu.memory_space<vmem>>, vector<128x32xf32>,
    return
  }
  func.func @transform_0(%arg0: i32) -> (i32, i32) {
    %c0_i32 = arith.constant 0 : i32
    %c0_i32_0 = arith.constant 0 : i32
    return %arg0, %c0_i32 : i32, i32
  }
  func.func @transform_1(%arg0: i32) -> (i32, i32) {
    %c0_i32 = arith.constant 0 : i32
    %c0_i32_0 = arith.constant 0 : i32
    %c0_i32_1 = arith.constant 0 : i32
    return %c0_i32, %c0_i32_0 : i32, i32
  }
  func.func @transform_2(%arg0: i32) -> (i32, i32) {
    %c0_i32 = arith.constant 0 : i32
    %c0_i32_0 = arith.constant 0 : i32
    %c0_i32_1 = arith.constant 0 : i32
    return %c0_i32, %c0_i32_0 : i32, i32
  }
  func.func @transform_3(%arg0: i32) -> (i32, i32) {
    %c0_i32 = arith.constant 0 : i32
    %c0_i32_0 = arith.constant 0 : i32
    %c0_i32_1 = arith.constant 0 : i32
    return %c0_i32, %c0_i32_0 : i32, i32
  }
  func.func @transform_4(%arg0: i32) -> (i32, i32) {
    %c0_i32 = arith.constant 0 : i32
    %c0_i32_0 = arith.constant 0 : i32
    %c0_i32_1 = arith.constant 0 : i32
    return %c0_i32, %c0_i32_0 : i32, i32
  }
  func.func @transform_5(%arg0: i32) -> (i32, i32) {
    %c0_i32 = arith.constant 0 : i32
    %c0_i32_0 = arith.constant 0 : i32
    %c0_i32_1 = arith.constant 0 : i32
    return %c0_i32, %c0_i32_0 : i32, i32
  }
  func.func @transform_6(%arg0: i32) -> (i32, i32) {
    %c0_i32 = arith.constant 0 : i32
    %c0_i32_0 = arith.constant 0 : i32
    %c0_i32_1 = arith.constant 0 : i32
    return %c0_i32, %c0_i32_0 : i32, i32
  }
  func.func @transform_7(%arg0: i32) -> (i32, i32) {
    %c0_i32 = arith.constant 0 : i32
    %c0_i32_0 = arith.constant 0 : i32
    return %arg0, %c0_i32 : i32, i32
  }
}

</mosaic_0001>

<bundles_post_ra>
// kernel: tpu_custom_call.1
= control target key start
LH: loop header
LB: loop body
LE: loop exit
PB: predicated region body
PF: predicated region fallthrough
CT: control target
= control target key end

     0   :  { %s1148_s24 = smov 0   ;;  %s1295_s0 = inlined_call_operand.vmem [shape: f32[256,32], index: 0, kind: input, shape index: {}]   ;;  %s1296_s1 = inlined_call_operand.vmem [shape: bf16[32,128], index: 1, kind: input, shape index: {}]   ;;  %s1297_s2 = inlined_call_operand.vmem [shape: f32[1,128], index: 2, kind: input, shape index: {}]   ;;  %s1298_s3 = inlined_call_operand.vmem [shape: bf16[128,128], index: 3, kind: input, shape index: {}]   ;;  %s1299_s4 = inlined_call_operand.vmem [shape: f32[1,128], index: 4, kind: input, shape index: {}]   ;;  %s1300_s5 = inlined_call_operand.vmem [shape: bf16[128,32], index: 5, kind: input, shape index: {}]   ;;  %s1301_s6 = inlined_call_operand.vmem [shape: f32[1,32], index: 6, kind: input, shape index: {}]   ;;  %s1302_s7 = inlined_call_operand.vmem [shape: f32[256,32], index: 7, kind: output, shape index: {}]  }
   0x1 LB: > { %s908_s25 = sadd.s32 4294967295, %s1106_s24   ;;  %p912_p0 = scmp.ge.s32.totalorder %s1106_s24, 1  ;;  %s1106_s24 = sphi %s1148_s24, %s17_s24  }
   0x2   : > { %p238_p1 = scmp.lt.s32.totalorder %s1106_s24, 3 }
   0x4   : > { %p239_p2 = pnand %p912_p0, %p238_p1 }
   0x5   : > { %v1082_v0 = vld [vmem:[%s1296_s1] sm:$0xff] (!%p239_p2)   ;;  %s913_s28 = sshll.u32 (!%p239_p2), %s908_s25, 4  ;;  %v1083_v1 = vld [vmem:[%s1296_s1 + $0x8] sm:$0xff] (!%p239_p2)   ;;  %v1086_v4 = vld [vmem:[%s1298_s3 + $0x10] sm:$0xff] (!%p239_p2)   ;;  %vm330_vm0 = vcmask (!%p239_p2), 261120  }
   0x6   : > { %242 = sbr.rel (%p239_p2) target bundleno = 706 (0x2c2), region = 48  ;;  %p271_p3 = scmp.lt.s32.totalorder (!%p239_p2), %s913_s28, 31  ;;  %990 = vmatprep.subr.bf16.mxu0 (!%p239_p2), %v1082_v0  ;;  %v1084_v2 = vld [vmem:[%s1298_s3] sm:$0xff] (!%p239_p2)   ;;  %v1085_v3 = vld [vmem:[%s1298_s3 + $0x8] sm:$0xff] (!%p239_p2)   ;;  %v1087_v14 = vld [vmem:[%s1298_s3 + $0x18] sm:$0xff] (!%p239_p2)  }
   0x7   : > { %991 = vmatpush3.bf16.msra.mxu0 (!%p239_p2), %v1082_v0  ;;  %1010 = vmatprep.subr.bf16.mxu1 (!%p239_p2), %v1084_v2  ;;  %v1088_v18 = vld [vmem:[%s1298_s3 + $0x20] sm:$0xff] (!%p239_p2)   ;;  %v1089_v22 = vld [vmem:[%s1298_s3 + $0x28] sm:$0xff] (!%p239_p2)   ;;  %v1090_v32 = vld [vmem:[%s1298_s3 + $0x30] sm:$0xff] (!%p239_p2)  }
   0x8   : > { %992 = vmatprep.subr.bf16.mxu0 (!%p239_p2), %v1083_v1  ;;  %1011 = vmatpush3.bf16.msra.mxu1 (!%p239_p2), %v1084_v2  ;;  %v1091_v33 = vld [vmem:[%s1298_s3 + $0x38] sm:$0xff] (!%p239_p2)   ;;  %v1092_v34 = vld [vmem:[%s1300_s5] sm:$0xff] (!%p239_p2)   ;;  %v1093_v35 = vld [vmem:[%s1300_s5 + $0x8] sm:$0xff] (!%p239_p2)  }
   0x9   : > { %1012 = vmatprep.subr.bf16.mxu1 (!%p239_p2), %v1085_v3  ;;  %v1094_v36 = vld [vmem:[%s1300_s5 + $0x10] sm:$0xff] (!%p239_p2)   ;;  %v1095_v37 = vld [vmem:[%s1300_s5 + $0x18] sm:$0xff] (!%p239_p2)   ;;  %v1096_v38 = vld [vmem:[%s1300_s5 + $0x20] sm:$0xff] (!%p239_p2)  }
   0xa   : > { %v1097_v39 = vld [vmem:[%s1300_s5 + $0x28] sm:$0xff] (!%p239_p2)   ;;  %v917_v40 = vld [vmem:[%s1297_s2] ss:$0 sm:$0xff] (!%p239_p2) }
   0xb   : > { %993 = vmatpush3.bf16.msra.mxu0 (!%p239_p2), %v1083_v1 }
   0xc   : > { %1013 = vmatpush3.bf16.msra.mxu1 (!%p239_p2), %v1085_v3  ;;  %1042 = vmatprep.subr.bf16.mxu0 (!%p239_p2), %v1092_v34 }
   0xd   : > { %s1304_s28 = smov (!%p271_p3, %s913_s28), 31  ;;  %1014 = vmatprep.subr.bf16.mxu1 %v1086_v4 }
   0xe   : > { %s914_s12 = sshll.u32 %s1304_s28, 3 }
   0xf   : > { %s1176_s15 = scalar_lea.vmem %s1295_s0, %s914_s12  ;;  %s1258_s11 = scalar_lea.vmem %s1302_s7, %s914_s12 }
  0x10   : > { %v283_v5 = vld [vmem:[%s1176_s15] sm:$0xff]  ;;  %v284_v6 = vld [vmem:[%s1176_s15 + $0x8] sm:$0xff]  ;;  %v285_v7 = vld [vmem:[%s1176_s15 + $0x10] sm:$0xff]  ;;  %1015 = vmatpush3.bf16.msra.mxu1 %v1086_v4 }
  0x11   : > { %v299_v8 = vpack.c.bf16 %v284_v6, %v283_v5  ;;  %v286_v9 = vld [vmem:[%s1176_s15 + $0x18] sm:$0xff]  ;;  %v287_v10 = vld [vmem:[%s1176_s15 + $0x20] sm:$0xff]  ;;  %v288_v11 = vld [vmem:[%s1176_s15 + $0x28] sm:$0xff]  ;;  %1016 = vmatprep.subr.bf16.mxu1 %v1087_v14 }
  0x12   : > { %v300_v12 = vpack.c.bf16 %v286_v9, %v285_v7  ;;  %v301_v13 = vpack.c.bf16 %v288_v11, %v287_v10  ;;  %v289_v15 = vld [vmem:[%s1176_s15 + $0x30] sm:$0xff]  ;;  %v290_v16 = vld [vmem:[%s1176_s15 + $0x38] sm:$0xff]  ;;  %v291_v17 = vld [vmem:[%s1176_s15 + $0x40] sm:$0xff] }
  0x13   : > { %994 = vmatprep.mubr.msk.bf16.mxu0 %vm330_vm0, %v299_v8  ;;  %v292_v19 = vld [vmem:[%s1176_s15 + $0x48] sm:$0xff]  ;;  %v302_v20 = vpack.c.bf16 %v290_v16, %v289_v15  ;;  %v293_v23 = vld [vmem:[%s1176_s15 + $0x50] sm:$0xff]  ;;  %v294_v24 = vld [vmem:[%s1176_s15 + $0x58] sm:$0xff] }
  0x14   : > { %995 = vmatmul.mubr.msk.bf16.vlgmr.msra.gmra.mrb[0].mxu0 %vm330_vm0, %v300_v12  ;;  %v303_v21 = vpack.c.bf16 %v292_v19, %v291_v17  ;;  %1017 = vmatpush3.bf16.msra.mxu1 %v1087_v14  ;;  %v295_v25 = vld [vmem:[%s1176_s15 + $0x60] sm:$0xff]  ;;  %v296_v26 = vld [vmem:[%s1176_s15 + $0x68] sm:$0xff]  ;;  %v304_v27 = vpack.c.bf16 %v294_v24, %v293_v23  ;;  %v297_v29 = vld [vmem:[%s1176_s15 + $0x70] sm:$0xff] }
  0x15   : > { %998 = vmatprep.mubr.msk.bf16.mxu0 %vm330_vm0, %v301_v13  ;;  %1018 = vmatprep.subr.bf16.mxu1 %v1088_v18  ;;  %v305_v28 = vpack.c.bf16 %v296_v26, %v295_v25  ;;  %v298_v30 = vld [vmem:[%s1176_s15 + $0x78] sm:$0xff] }
  0x16   : > { %v306_v31 = vpack.c.bf16 %v298_v30, %v297_v29  ;;  %1043 = vmatpush3.bf16.msra.mxu0 %v1092_v34  ;;  %v1099_v34 = vld [vmem:[%s1300_s5 + $0x38] sm:$0xff]  }
  0x17   : > { %1044 = vmatprep.subr.bf16.mxu0 %v1093_v35 }
  0x18   : > { %1019 = vmatpush3.bf16.msra.mxu1 %v1088_v18 }
  0x19   : > { %1020 = vmatprep.subr.bf16.mxu1 %v1089_v22 }
  0x1a   : > { %1045 = vmatpush3.bf16.msra.mxu0 %v1093_v35  ;;  %v928_v35 = vld [vmem:[%s1299_s4] ss:$0 sm:$0xff] }
  0x1b   : > { %1046 = vmatprep.subr.bf16.mxu0 %v1094_v36 }
  0x1c   : > { %999 = vmatmul.mubr.msk.bf16.gmra.mrb[4].mxu0 %vm330_vm0, %v302_v20  ;;  %1021 = vmatpush3.bf16.msra.mxu1 %v1089_v22 }
  0x1d   : > { %1002 = vmatprep.mubr.msk.bf16.mxu0 %vm330_vm0, %v303_v21  ;;  %1022 = vmatprep.subr.bf16.mxu1 %v1090_v32 }
  0x1e   : > { %1047 = vmatpush3.bf16.msra.mxu0 %v1094_v36 }
  0x1f   : > { %1048 = vmatprep.subr.bf16.mxu0 %v1095_v37 }
  0x20   : > { %1023 = vmatpush3.bf16.msra.mxu1 %v1090_v32 }
  0x21   : > { %1024 = vmatprep.subr.bf16.mxu1 %v1091_v33 }
  0x22   : > { %1049 = vmatpush3.bf16.msra.mxu0 %v1095_v37 }
  0x23   : > { %1050 = vmatprep.subr.bf16.mxu0 %v1096_v38 }
  0x24   : > { %1003 = vmatmul.mubr.msk.bf16.gmra.mrb[8].mxu0 %vm330_vm0, %v304_v27  ;;  %1025 = vmatpush3.bf16.msra.mxu1 %v1091_v33  ;;  %v1098_v33 = vld [vmem:[%s1300_s5 + $0x30] sm:$0xff]  }
  0x25   : > { %1006 = vmatprep.mubr.msk.bf16.mxu0 %vm330_vm0, %v305_v28 }
  0x26   : > { %1051 = vmatpush3.bf16.msra.mxu0 %v1096_v38 }
  0x27   : > { %1052 = vmatprep.subr.bf16.mxu0 %v1097_v39 }
  0x2a   : > { %1053 = vmatpush3.bf16.msra.mxu0 %v1097_v39 }
  0x2b   : > { %1054 = vmatprep.subr.bf16.mxu0 %v1098_v33 }
  0x2c   : > { %1007 = vmatmul.mubr.msk.bf16.gmra.mrb[12].mxu0 %vm330_vm0, %v306_v31 }
  0x2e   : > { %1055 = vmatpush3.bf16.msra.mxu0 %v1098_v33 }
  0x2f   : > { %1056 = vmatprep.subr.bf16.mxu0 %v1099_v34 }
  0x32   : > { %1057 = vmatpush3.bf16.msra.mxu0 %v1099_v34 }
  0xe7   : > { %v996_v41 = vpop.f32.mrb[0].mxu0 }
  0xe8   : > { %v398_v42 = vadd.f32 %v996_v41, %v917_v40  ;;  %v389_v43 = vpop.f32.mrb[1].mxu0 }
  0xe9   : > { %v390_v44 = vadd.f32 %v917_v40, %v389_v43  ;;  %v997_v45 = vpop.f32.mrb[2].mxu0 }
  0xea   : > { %v401_v46 = vadd.f32 %v997_v45, %v917_v40  ;;  %v392_v47 = vpop.f32.mrb[3].mxu0  ;;  %v454_v49 = vmax.f32 %v398_v42, 0.0 }
  0xeb   : > { %v393_v48 = vadd.f32 %v917_v40, %v392_v47  ;;  %v452_v51 = vmax.f32 %v390_v44, 0.0 }
  0xec   : > { %v455_v50 = vmax.f32 %v401_v46, 0.0 }
  0xed   : > { %v453_v52 = vmax.f32 %v393_v48, 0.0 }
  0xee   : > { %v469_v53 = vpack.c.bf16 %v455_v50, %v454_v49 }
  0xef   : > { %v1000_v54 = vpop.f32.mrb[4].mxu0  ;;  %v468_v55 = vpack.c.bf16 %v453_v52, %v452_v51 }
  0xf0   : > { %v414_v56 = vadd.f32 %v1000_v54, %v917_v40  ;;  %v405_v57 = vpop.f32.mrb[5].mxu0 }
  0xf1   : > { %v406_v58 = vadd.f32 %v917_v40, %v405_v57  ;;  %v1001_v59 = vpop.f32.mrb[6].mxu0  ;;  %1026 = vmatprep.mubr.bf16.mxu1 %v468_v55 }
  0xf2   : > { %v417_v60 = vadd.f32 %v1001_v59, %v917_v40  ;;  %v408_v61 = vpop.f32.mrb[7].mxu0  ;;  %1027 = vmatmul.mubr.bf16.vlgmr.msra.gmra.mrb[0].mxu1 %v469_v53  ;;  %v458_v63 = vmax.f32 %v414_v56, 0.0 }
  0xf3   : > { %v409_v62 = vadd.f32 %v917_v40, %v408_v61  ;;  %v456_v1 = vmax.f32 %v406_v58, 0.0 }
  0xf4   : > { %v459_v0 = vmax.f32 %v417_v60, 0.0 }
  0xf5   : > { %v457_v2 = vmax.f32 %v409_v62, 0.0 }
  0xf6   : > { %v471_v3 = vpack.c.bf16 %v459_v0, %v458_v63 }
  0xf7   : > { %v470_v4 = vpack.c.bf16 %v457_v2, %v456_v1  ;;  %v1004_v5 = vpop.f32.mrb[8].mxu0 }
  0xf8   : > { %v430_v6 = vadd.f32 %v1004_v5, %v917_v40  ;;  %v421_v7 = vpop.f32.mrb[9].mxu0 }
  0xf9   : > { %v422_v8 = vadd.f32 %v917_v40, %v421_v7  ;;  %v1005_v9 = vpop.f32.mrb[10].mxu0  ;;  %1030 = vmatprep.mubr.bf16.mxu1 %v470_v4 }
  0xfa   : > { %v433_v10 = vadd.f32 %v1005_v9, %v917_v40  ;;  %v424_v11 = vpop.f32.mrb[11].mxu0  ;;  %1031 = vmatmul.mubr.bf16.gmra.mrb[4].mxu1 %v471_v3  ;;  %v462_v13 = vmax.f32 %v430_v6, 0.0 }
  0xfb   : > { %v425_v12 = vadd.f32 %v917_v40, %v424_v11  ;;  %v460_v15 = vmax.f32 %v422_v8, 0.0 }
  0xfc   : > { %v463_v14 = vmax.f32 %v433_v10, 0.0 }
  0xfd   : > { %v461_v16 = vmax.f32 %v425_v12, 0.0 }
  0xfe   : > { %v473_v17 = vpack.c.bf16 %v463_v14, %v462_v13 }
  0xff   : > { %v472_v18 = vpack.c.bf16 %v461_v16, %v460_v15  ;;  %v1008_v19 = vpop.f32.mrb[12].mxu0 }
 0x100   : > { %v446_v20 = vadd.f32 %v1008_v19, %v917_v40  ;;  %v437_v21 = vpop.f32.mrb[13].mxu0 }
 0x101   : > { %v438_v22 = vadd.f32 %v917_v40, %v437_v21  ;;  %v1009_v23 = vpop.f32.mrb[14].mxu0  ;;  %1034 = vmatprep.mubr.bf16.mxu1 %v472_v18 }
 0x102   : > { %v449_v24 = vadd.f32 %v1009_v23, %v917_v40  ;;  %v440_v25 = vpop.f32.mrb[15].mxu0  ;;  %1035 = vmatmul.mubr.bf16.gmra.mrb[8].mxu1 %v473_v17  ;;  %v466_v27 = vmax.f32 %v446_v20, 0.0 }
 0x103   : > { %v441_v26 = vadd.f32 %v917_v40, %v440_v25  ;;  %v464_v29 = vmax.f32 %v438_v22, 0.0 }
 0x104   : > { %v467_v28 = vmax.f32 %v449_v24, 0.0 }
 0x105   : > { %v465_v30 = vmax.f32 %v441_v26, 0.0 }
 0x106   : > { %v475_v31 = vpack.c.bf16 %v467_v28, %v466_v27  ;;  %v937_v28 = vld [vmem:[%s1301_s6] ss:$0 sm:$0xff] }
 0x107   : > { %v474_v32 = vpack.c.bf16 %v465_v30, %v464_v29 }
 0x109   : > { %1038 = vmatprep.mubr.bf16.mxu1 %v474_v32 }
 0x10a   : > { %1039 = vmatmul.mubr.bf16.gmra.mrb[12].mxu1 %v475_v31 }
 0x1c5   : > { %v1028_v36 = vpop.f32.mrb[0].mxu1 }
 0x1c6   : > { %v590_v37 = vadd.f32 %v1028_v36, %v928_v35  ;;  %v581_v38 = vpop.f32.mrb[1].mxu1 }
 0x1c7   : > { %v582_v39 = vadd.f32 %v928_v35, %v581_v38  ;;  %v1029_v40 = vpop.f32.mrb[2].mxu1 }
 0x1c8   : > { %v593_v41 = vadd.f32 %v1029_v40, %v928_v35  ;;  %v584_v42 = vpop.f32.mrb[3].mxu1  ;;  %v646_v44 = vmax.f32 %v590_v37, 0.0 }
 0x1c9   : > { %v585_v43 = vadd.f32 %v928_v35, %v584_v42  ;;  %v644_v46 = vmax.f32 %v582_v39, 0.0 }
 0x1ca   : > { %v647_v45 = vmax.f32 %v593_v41, 0.0 }
 0x1cb   : > { %v645_v47 = vmax.f32 %v585_v43, 0.0 }
 0x1cc   : > { %v661_v48 = vpack.c.bf16 %v647_v45, %v646_v44 }
 0x1cd   : > { %v660_v49 = vpack.c.bf16 %v645_v47, %v644_v46  ;;  %v1032_v50 = vpop.f32.mrb[4].mxu1 }
 0x1ce   : > { %v606_v51 = vadd.f32 %v1032_v50, %v928_v35  ;;  %v597_v52 = vpop.f32.mrb[5].mxu1 }
 0x1cf   : > { %v598_v53 = vadd.f32 %v928_v35, %v597_v52  ;;  %v1033_v54 = vpop.f32.mrb[6].mxu1  ;;  %1058 = vmatprep.mubr.bf16.mxu0 %v660_v49 }
 0x1d0   : > { %v609_v55 = vadd.f32 %v1033_v54, %v928_v35  ;;  %v600_v56 = vpop.f32.mrb[7].mxu1  ;;  %1059 = vmatmul.mubr.bf16.vlgmr.msra.gmra.mrb[16].mxu0 %v661_v48  ;;  %v650_v58 = vmax.f32 %v606_v51, 0.0 }
 0x1d1   : > { %v601_v57 = vadd.f32 %v928_v35, %v600_v56  ;;  %v648_v60 = vmax.f32 %v598_v53, 0.0 }
 0x1d2   : > { %v651_v59 = vmax.f32 %v609_v55, 0.0 }
 0x1d3   : > { %v649_v61 = vmax.f32 %v601_v57, 0.0 }
 0x1d4   : > { %v663_v62 = vpack.c.bf16 %v651_v59, %v650_v58 }
 0x1d5   : > { %v662_v63 = vpack.c.bf16 %v649_v61, %v648_v60  ;;  %v1036_v0 = vpop.f32.mrb[8].mxu1 }
 0x1d6   : > { %v622_v1 = vadd.f32 %v1036_v0, %v928_v35  ;;  %v613_v2 = vpop.f32.mrb[9].mxu1 }
 0x1d7   : > { %v614_v3 = vadd.f32 %v928_v35, %v613_v2  ;;  %v1037_v4 = vpop.f32.mrb[10].mxu1  ;;  %1062 = vmatprep.mubr.bf16.mxu0 %v662_v63 }
 0x1d8   : > { %v625_v5 = vadd.f32 %v1037_v4, %v928_v35  ;;  %v616_v6 = vpop.f32.mrb[11].mxu1  ;;  %1063 = vmatmul.mubr.bf16.gmra.mrb[20].mxu0 %v663_v62  ;;  %v654_v8 = vmax.f32 %v622_v1, 0.0 }
 0x1d9   : > { %v617_v7 = vadd.f32 %v928_v35, %v616_v6  ;;  %v652_v10 = vmax.f32 %v614_v3, 0.0 }
 0x1da   : > { %v655_v9 = vmax.f32 %v625_v5, 0.0 }
 0x1db   : > { %v653_v11 = vmax.f32 %v617_v7, 0.0 }
 0x1dc   : > { %v665_v12 = vpack.c.bf16 %v655_v9, %v654_v8 }
 0x1dd   : > { %v664_v13 = vpack.c.bf16 %v653_v11, %v652_v10  ;;  %v1040_v14 = vpop.f32.mrb[12].mxu1 }
 0x1de   : > { %v638_v15 = vadd.f32 %v1040_v14, %v928_v35  ;;  %v629_v16 = vpop.f32.mrb[13].mxu1 }
 0x1df   : > { %v630_v17 = vadd.f32 %v928_v35, %v629_v16  ;;  %v1041_v18 = vpop.f32.mrb[14].mxu1  ;;  %1066 = vmatprep.mubr.bf16.mxu0 %v664_v13 }
 0x1e0   : > { %v641_v19 = vadd.f32 %v1041_v18, %v928_v35  ;;  %v632_v20 = vpop.f32.mrb[15].mxu1  ;;  %1067 = vmatmul.mubr.bf16.gmra.mrb[24].mxu0 %v665_v12  ;;  %v658_v22 = vmax.f32 %v638_v15, 0.0 }
 0x1e1   : > { %v633_v21 = vadd.f32 %v928_v35, %v632_v20  ;;  %v656_v24 = vmax.f32 %v630_v17, 0.0 }
 0x1e2   : > { %v659_v23 = vmax.f32 %v641_v19, 0.0 }
 0x1e3   : > { %v657_v25 = vmax.f32 %v633_v21, 0.0 }
 0x1e4   : > { %v667_v26 = vpack.c.bf16 %v659_v23, %v658_v22 }
 0x1e5   : > { %v666_v27 = vpack.c.bf16 %v657_v25, %v656_v24 }
 0x1e7   : > { %1070 = vmatprep.mubr.bf16.mxu0 %v666_v27 }
 0x1e8   : > { %1071 = vmatmul.mubr.bf16.gmra.mrb[28].mxu0 %v667_v26 }
 0x2a3   : > { %v1060_v29 = vpop.f32.mrb[16].mxu0 }
 0x2a4   : > { %v782_v30 = vadd.f32 %v1060_v29, %v937_v28  ;;  %v773_v31 = vpop.f32.mrb[17].mxu0 }
 0x2a5   : > { %v774_v32 = vadd.f32 %v937_v28, %v773_v31  ;;  %v1061_v33 = vpop.f32.mrb[18].mxu0 }
 0x2a6   : > { %838 = vst.msk [vmem:[%s1258_s11 + $0x10] sm:$0xff] %vm330_vm0, %v782_v30  ;;  %v785_v34 = vadd.f32 %v1061_v33, %v937_v28  ;;  %v776_v35 = vpop.f32.mrb[19].mxu0 }
 0x2a7   : > { %836 = vst.msk [vmem:[%s1258_s11] sm:$0xff] %vm330_vm0, %v774_v32  ;;  %v777_v36 = vadd.f32 %v937_v28, %v776_v35 }
 0x2a8   : > { %839 = vst.msk [vmem:[%s1258_s11 + $0x18] sm:$0xff] %vm330_vm0, %v785_v34 }
 0x2a9   : > { %837 = vst.msk [vmem:[%s1258_s11 + $0x8] sm:$0xff] %vm330_vm0, %v777_v36 }
 0x2ab   : > { %v1064_v37 = vpop.f32.mrb[20].mxu0 }
 0x2ac   : > { %v798_v38 = vadd.f32 %v1064_v37, %v937_v28  ;;  %v789_v39 = vpop.f32.mrb[21].mxu0 }
 0x2ad   : > { %v790_v40 = vadd.f32 %v937_v28, %v789_v39  ;;  %v1065_v41 = vpop.f32.mrb[22].mxu0 }
 0x2ae   : > { %842 = vst.msk [vmem:[%s1258_s11 + $0x30] sm:$0xff] %vm330_vm0, %v798_v38  ;;  %v801_v42 = vadd.f32 %v1065_v41, %v937_v28  ;;  %v792_v43 = vpop.f32.mrb[23].mxu0 }
 0x2af   : > { %840 = vst.msk [vmem:[%s1258_s11 + $0x20] sm:$0xff] %vm330_vm0, %v790_v40  ;;  %v793_v44 = vadd.f32 %v937_v28, %v792_v43 }
 0x2b0   : > { %843 = vst.msk [vmem:[%s1258_s11 + $0x38] sm:$0xff] %vm330_vm0, %v801_v42 }
 0x2b1   : > { %841 = vst.msk [vmem:[%s1258_s11 + $0x28] sm:$0xff] %vm330_vm0, %v793_v44 }
 0x2b3   : > { %v1068_v45 = vpop.f32.mrb[24].mxu0 }
 0x2b4   : > { %v814_v46 = vadd.f32 %v1068_v45, %v937_v28  ;;  %v805_v47 = vpop.f32.mrb[25].mxu0 }
 0x2b5   : > { %v806_v48 = vadd.f32 %v937_v28, %v805_v47  ;;  %v1069_v49 = vpop.f32.mrb[26].mxu0 }
 0x2b6   : > { %846 = vst.msk [vmem:[%s1258_s11 + $0x50] sm:$0xff] %vm330_vm0, %v814_v46  ;;  %v817_v50 = vadd.f32 %v1069_v49, %v937_v28  ;;  %v808_v51 = vpop.f32.mrb[27].mxu0 }
 0x2b7   : > { %844 = vst.msk [vmem:[%s1258_s11 + $0x40] sm:$0xff] %vm330_vm0, %v806_v48  ;;  %v809_v52 = vadd.f32 %v937_v28, %v808_v51 }
 0x2b8   : > { %847 = vst.msk [vmem:[%s1258_s11 + $0x58] sm:$0xff] %vm330_vm0, %v817_v50 }
 0x2b9   : > { %845 = vst.msk [vmem:[%s1258_s11 + $0x48] sm:$0xff] %vm330_vm0, %v809_v52 }
 0x2bb   : > { %v1072_v53 = vpop.f32.mrb[28].mxu0 }
 0x2bc   : > { %v830_v54 = vadd.f32 %v1072_v53, %v937_v28  ;;  %v821_v55 = vpop.f32.mrb[29].mxu0 }
 0x2bd   : > { %v822_v56 = vadd.f32 %v937_v28, %v821_v55  ;;  %v1073_v57 = vpop.f32.mrb[30].mxu0 }
 0x2be   : > { %850 = vst.msk [vmem:[%s1258_s11 + $0x70] sm:$0xff] %vm330_vm0, %v830_v54  ;;  %v833_v58 = vadd.f32 %v1073_v57, %v937_v28  ;;  %v824_v59 = vpop.f32.mrb[31].mxu0 }
 0x2bf   : > { %848 = vst.msk [vmem:[%s1258_s11 + $0x60] sm:$0xff] %vm330_vm0, %v822_v56  ;;  %v825_v60 = vadd.f32 %v937_v28, %v824_v59 }
 0x2c0   : > { %851 = vst.msk [vmem:[%s1258_s11 + $0x78] sm:$0xff] %vm330_vm0, %v833_v58 }
 0x2c1   : > { %849 = vst.msk [vmem:[%s1258_s11 + $0x68] sm:$0xff] %vm330_vm0, %v825_v60 }
 0x2c2 PF: > { %s17_s24 = sadd.s32 1, %s1106_s24  }
 0x2c3   : > { %p14_p4 = scmp.ge.s32.totalorder %s17_s24, 4  }
 0x2c5   :  { %16 = sbr.rel (!%p14_p4) target bundleno = 1 (0x1), region = 78 }

</bundles_post_ra>
